<compile_context>
chip_gen: v7x
topology: tpu7x:2x2x1
jax: 0.10.0
libtpu: 0.0.40
codegen_flags: <defaults>
</compile_context>

<pallas_src>
import math

import jax
import jax.numpy as jnp
from jax import lax
from jax.experimental import pallas as pl
from jax.experimental.pallas import tpu as pltpu

IMAGE_PIXELS = 28 * 28      # 784
N_HIDDEN = 128
N_LABELS = 10
N_LABELS_PADDED = 128       # lane-dense logits path (sliced back to 10 outside)


def _round_up(x, m):
    return ((x + m - 1) // m) * m


def _gelu_exact(x):
    # PyTorch F.gelu default is the exact (erf-based) GELU. Computed in f32.
    return 0.5 * x * (1.0 + lax.erf(x * (1.0 / math.sqrt(2.0))))


def mlp_kernel(x_ref, w1_ref, b1_ref, w2_ref, b2_ref, w3_ref, b3_ref, o_ref):
    # x tile arrives f32 straight from HBM; cast to bf16 here (free on the VPU
    # under the DMA) instead of a separate wrapper-side cast pass over HBM.
    x = x_ref[...].astype(jnp.bfloat16)

    # fc1 + GELU (bf16 operands, f32 accumulation; elementwise math in f32)
    h1 = jnp.dot(x, w1_ref[...], preferred_element_type=jnp.float32) + b1_ref[...]
    h1 = _gelu_exact(h1)

    # fc2 + GELU
    h2 = jnp.dot(h1.astype(jnp.bfloat16), w2_ref[...],
                 preferred_element_type=jnp.float32) + b2_ref[...]
    h2 = _gelu_exact(h2)

    # fc3 (logits, padded to 128 lanes -> full-lane vst, no activation)
    logits = jnp.dot(h2.astype(jnp.bfloat16), w3_ref[...],
                     preferred_element_type=jnp.float32) + b3_ref[...]
    o_ref[...] = logits.astype(o_ref.dtype)


def network_forward(x, p, *, tile_b=1024):
    """x: (B, 784) float32; p: prepared params (see prepare_params)."""
    B = x.shape[0]

    # Tile the batch:
    #  * keep >= 2 grid steps when B allows it (v7x shards the "parallel" axis
    #    across its 2 TensorCores; grid=(1,) would idle one TC),
    #  * round to 8 sublanes (x is f32 at the boundary),
    #  * no padding copy of x: cdiv grid + masked boundary tiles handle the tail.
    two_way = max(8, _round_up(pl.cdiv(B, 2), 8))
    tb = max(8, min(tile_b, two_way))
    grid = (pl.cdiv(B, tb),)

    out = pl.pallas_call(
        mlp_kernel,
        out_shape=jax.ShapeDtypeStruct((B, N_LABELS_PADDED), jnp.float32),
        grid=grid,
        in_specs=[
            pl.BlockSpec((tb, IMAGE_PIXELS), lambda i: (i, 0)),           # x tile (f32)
            pl.BlockSpec((IMAGE_PIXELS, N_HIDDEN), lambda i: (0, 0)),     # w1 (resident)
            pl.BlockSpec((1, N_HIDDEN), lambda i: (0, 0)),                # b1
            pl.BlockSpec((N_HIDDEN, N_HIDDEN), lambda i: (0, 0)),         # w2
            pl.BlockSpec((1, N_HIDDEN), lambda i: (0, 0)),                # b2
            pl.BlockSpec((N_HIDDEN, N_LABELS_PADDED), lambda i: (0, 0)),  # w3 (padded)
            pl.BlockSpec((1, N_LABELS_PADDED), lambda i: (0, 0)),         # b3 (padded)
        ],
        out_specs=pl.BlockSpec((tb, N_LABELS_PADDED), lambda i: (i, 0)),
        compiler_params=pltpu.CompilerParams(
            dimension_semantics=("parallel",),
        ),
    )(x, p["w1"], p["b1"], p["w2"], p["b2"], p["w3"], p["b3"])

    # Padded lanes are exactly zero (zero-padded w3/b3); slice the real logits.
    return out[:, :N_LABELS]


def init_params(key):
    """Deterministic init mimicking nn.Linear (uniform(-1/sqrt(in), 1/sqrt(in))).
    Weights are stored transposed: (in_features, out_features), f32."""
    ks = jax.random.split(key, 6)

    def linear(kw, kb, fan_in, fan_out):
        bound = 1.0 / math.sqrt(fan_in)
        w = jax.random.uniform(kw, (fan_in, fan_out), jnp.float32, -bound, bound)
        b = jax.random.uniform(kb, (1, fan_out), jnp.float32, -bound, bound)
        return w, b

    w1, b1 = linear(ks[0], ks[1], IMAGE_PIXELS, N_HIDDEN)
    w2, b2 = linear(ks[2], ks[3], N_HIDDEN, N_HIDDEN)
    w3, b3 = linear(ks[4], ks[5], N_HIDDEN, N_LABELS)
    return dict(w1=w1, b1=b1, w2=w2, b2=b2, w3=w3, b3=b3)


def prepare_params(p):
    """One-time prep: pad fc3 to 128 output lanes, cast matmul weights to bf16
    (biases stay f32 and are added to the f32 accumulator)."""
    w3p = jnp.zeros((N_HIDDEN, N_LABELS_PADDED), jnp.float32).at[:, :N_LABELS].set(p["w3"])
    b3p = jnp.zeros((1, N_LABELS_PADDED), jnp.float32).at[:, :N_LABELS].set(p["b3"])
    return dict(
        w1=p["w1"].astype(jnp.bfloat16), b1=p["b1"],
        w2=p["w2"].astype(jnp.bfloat16), b2=p["b2"],
        w3=w3p.astype(jnp.bfloat16),     b3=b3p,
    )


def reference_forward(x, p):
    """Pure-JAX reference with identical dtype handling (bf16 operands, f32 acc)."""
    xb = x.astype(jnp.bfloat16)
    h = _gelu_exact(jnp.dot(xb, p["w1"], preferred_element_type=jnp.float32) + p["b1"])
    h = _gelu_exact(jnp.dot(h.astype(jnp.bfloat16), p["w2"],
                            preferred_element_type=jnp.float32) + p["b2"])
    out = jnp.dot(h.astype(jnp.bfloat16), p["w3"],
                  preferred_element_type=jnp.float32) + p["b3"]
    return out[:, :N_LABELS]


if __name__ == "__main__":
    key = jax.random.PRNGKey(0)
    k_params, k_x1, k_x2 = jax.random.split(key, 3)

    params = prepare_params(init_params(k_params))

    # Small batch: single tile, grid = (1,).
    x1 = jax.random.normal(k_x1, (8, IMAGE_PIXELS), jnp.float32)
    out1 = jax.block_until_ready(network_forward(x1, params))
    ref1 = reference_forward(x1, params)
    assert out1.shape == (8, N_LABELS)
    assert jnp.allclose(out1, ref1, atol=2e-2, rtol=2e-2)

    # Batch that is not a tile multiple: exercises the cdiv grid, the 2-step
    # split (v7x megacore path), and masked tail-tile writeback (no jnp.pad).
    x2 = jax.random.normal(k_x2, (50, IMAGE_PIXELS), jnp.float32)
    out2 = jax.block_until_ready(network_forward(x2, params))
    ref2 = reference_forward(x2, params)
    assert out2.shape == (50, N_LABELS)
    assert jnp.allclose(out2, ref2, atol=2e-2, rtol=2e-2)

    print("KERNEL_OK")
</pallas_src>

<mosaic_0001>
module attributes {stable_mosaic.version = 11 : i64} {
  func.func @mlp_kernel(%arg0: i32, %arg1: memref<8x784xf32, #tpu.memory_space<vmem>>, %arg2: memref<784x128xbf16, #tpu.memory_space<vmem>>, %arg3: memref<1x128xf32, #tpu.memory_space<vmem>>, %arg4: memref<128x128xbf16, #tpu.memory_space<vmem>>, %arg5: memref<1x128xf32, #tpu.memory_space<vmem>>, %arg6: memref<128x128xbf16, #tpu.memory_space<vmem>>, %arg7: memref<1x128xf32, #tpu.memory_space<vmem>>, %arg8: memref<8x128xf32, #tpu.memory_space<vmem>>) attributes {dimension_semantics = [#tpu.dimension_semantics<parallel>], iteration_bounds = array<i64: 1>, scalar_prefetch = 0 : i64, scratch_operands = 0 : i64, tpu.core_type = #tpu.core_type<tc>, window_params = [{transform_indices = @transform_0, window_bounds = array<i64: 8, 784>}, {pipeline_mode = #tpu.pipeline_mode<synchronous>, transform_indices = @transform_1, window_bounds = array<i64: 784, 128>}, {pipeline_mode = #tpu.pipeline_mode<synchronous>, transform_indices = @transform_2, window_bounds = array<i64: 1, 128>}, {pipeline_mode = #tpu.pipeline_mode<synchronous>, transform_indices = @transform_3, window_bounds = array<i64: 128, 128>}, {pipeline_mode = #tpu.pipeline_mode<synchronous>, transform_indices = @transform_4, window_bounds = array<i64: 1, 128>}, {pipeline_mode = #tpu.pipeline_mode<synchronous>, transform_indices = @transform_5, window_bounds = array<i64: 128, 128>}, {pipeline_mode = #tpu.pipeline_mode<synchronous>, transform_indices = @transform_6, window_bounds = array<i64: 1, 128>}, {transform_indices = @transform_7, window_bounds = array<i64: 8, 128>}]} {
    %c0 = arith.constant 0 : index
    %c0_0 = arith.constant 0 : index
    %0 = vector.load %arg1[%c0, %c0_0] : memref<8x784xf32, #tpu.memory_space<vmem>>, vector<8x784xf32>
    %1 = arith.truncf %0 : vector<8x784xf32> to vector<8x784xbf16>
    %c0_1 = arith.constant 0 : index
    %c0_2 = arith.constant 0 : index
    %2 = vector.load %arg2[%c0_1, %c0_2] : memref<784x128xbf16, #tpu.memory_space<vmem>>, vector<784x128xbf16>
    %cst = arith.constant dense<0.000000e+00> : vector<8x128xf32>
    %3 = tpu.matmul %1, %2, %cst {dimension_numbers = #tpu.dot_dimension_numbers<[1], [0], [0], [1], [0, 0, 1, 1], [], []>} : vector<8x784xbf16>, vector<784x128xbf16>, vector<8x128xf32> -> vector<8x128xf32>
    %c0_3 = arith.constant 0 : index
    %c0_4 = arith.constant 0 : index
    %4 = vector.load %arg3[%c0_3, %c0_4] : memref<1x128xf32, #tpu.memory_space<vmem>>, vector<1x128xf32>
    %5 = vector.broadcast %4 : vector<1x128xf32> to vector<8x128xf32>
    %6 = arith.addf %3, %5 : vector<8x128xf32>
    %cst_5 = arith.constant 5.000000e-01 : f32
    %7 = vector.broadcast %cst_5 : f32 to vector<8x128xf32>
    %8 = arith.mulf %7, %6 : vector<8x128xf32>
    %cst_6 = arith.constant 0.707106769 : f32
    %9 = vector.broadcast %cst_6 : f32 to vector<8x128xf32>
    %10 = arith.mulf %6, %9 : vector<8x128xf32>
    %11 = math.erf %10 : vector<8x128xf32>
    %cst_7 = arith.constant 1.000000e+00 : f32
    %12 = vector.broadcast %cst_7 : f32 to vector<8x128xf32>
    %13 = arith.addf %12, %11 : vector<8x128xf32>
    %14 = arith.mulf %8, %13 : vector<8x128xf32>
    %15 = arith.truncf %14 : vector<8x128xf32> to vector<8x128xbf16>
    %c0_8 = arith.constant 0 : index
    %c0_9 = arith.constant 0 : index
    %16 = vector.load %arg4[%c0_8, %c0_9] : memref<128x128xbf16, #tpu.memory_space<vmem>>, vector<128x128xbf16>
    %cst_10 = arith.constant dense<0.000000e+00> : vector<8x128xf32>
    %17 = tpu.matmul %15, %16, %cst_10 {dimension_numbers = #tpu.dot_dimension_numbers<[1], [0], [0], [1], [0, 0, 1, 1], [], []>} : vector<8x128xbf16>, vector<128x128xbf16>, vector<8x128xf32> -> vector<8x128xf32>
    %c0_11 = arith.constant 0 : index
    %c0_12 = arith.constant 0 : index
    %18 = vector.load %arg5[%c0_11, %c0_12] : memref<1x128xf32, #tpu.memory_space<vmem>>, vector<1x128xf32>
    %19 = vector.broadcast %18 : vector<1x128xf32> to vector<8x128xf32>
    %20 = arith.addf %17, %19 : vector<8x128xf32>
    %cst_13 = arith.constant 5.000000e-01 : f32
    %21 = vector.broadcast %cst_13 : f32 to vector<8x128xf32>
    %22 = arith.mulf %21, %20 : vector<8x128xf32>
    %cst_14 = arith.constant 0.707106769 : f32
    %23 = vector.broadcast %cst_14 : f32 to vector<8x128xf32>
    %24 = arith.mulf %20, %23 : vector<8x128xf32>
    %25 = math.erf %24 : vector<8x128xf32>
    %cst_15 = arith.constant 1.000000e+00 : f32
    %26 = vector.broadcast %cst_15 : f32 to vector<8x128xf32>
    %27 = arith.addf %26, %25 : vector<8x128xf32>
    %28 = arith.mulf %22, %27 : vector<8x128xf32>
    %29 = arith.truncf %28 : vector<8x128xf32> to vector<8x128xbf16>
    %c0_16 = arith.constant 0 : index
    %c0_17 = arith.constant 0 : index
    %30 = vector.load %arg6[%c0_16, %c0_17] : memref<128x128xbf16, #tpu.memory_space<vmem>>, vector<128x128xbf16>
    %cst_18 = arith.constant dense<0.000000e+00> : vector<8x128xf32>
    %31 = tpu.matmul %29, %30, %cst_18 {dimension_numbers = #tpu.dot_dimension_numbers<[1], [0], [0], [1], [0, 0, 1, 1], [], []>} : vector<8x128xbf16>, vector<128x128xbf16>, vector<8x128xf32> -> vector<8x128xf32>
    %c0_19 = arith.constant 0 : index
    %c0_20 = arith.constant 0 : index
    %32 = vector.load %arg7[%c0_19, %c0_20] : memref<1x128xf32, #tpu.memory_space<vmem>>, vector<1x128xf32>
    %33 = vector.broadcast %32 : vector<1x128xf32> to vector<8x128xf32>
    %34 = arith.addf %31, %33 : vector<8x128xf32>
    %c0_21 = arith.constant 0 : index
    %c0_22 = arith.constant 0 : index
    %35 = vector.load %arg8[%c0_21, %c0_22] : memref<8x128xf32, #tpu.memory_space<vmem>>, vector<8x128xf32>
    tpu.vector_store %arg8[%c0_21, %c0_22], %34 {strides = array<i32>} : memref<8x128xf32, #tpu.memory_space<vmem>>, vector<8x128xf32>,
    return
  }
  func.func @transform_0(%arg0: i32) -> (i32, i32) {
    %c0_i32 = arith.constant 0 : i32
    %c0_i32_0 = arith.constant 0 : i32
    return %arg0, %c0_i32 : i32, i32
  }
  func.func @transform_1(%arg0: i32) -> (i32, i32) {
    %c0_i32 = arith.constant 0 : i32
    %c0_i32_0 = arith.constant 0 : i32
    %c0_i32_1 = arith.constant 0 : i32
    return %c0_i32, %c0_i32_0 : i32, i32
  }
  func.func @transform_2(%arg0: i32) -> (i32, i32) {
    %c0_i32 = arith.constant 0 : i32
    %c0_i32_0 = arith.constant 0 : i32
    %c0_i32_1 = arith.constant 0 : i32
    return %c0_i32, %c0_i32_0 : i32, i32
  }
  func.func @transform_3(%arg0: i32) -> (i32, i32) {
    %c0_i32 = arith.constant 0 : i32
    %c0_i32_0 = arith.constant 0 : i32
    %c0_i32_1 = arith.constant 0 : i32
    return %c0_i32, %c0_i32_0 : i32, i32
  }
  func.func @transform_4(%arg0: i32) -> (i32, i32) {
    %c0_i32 = arith.constant 0 : i32
    %c0_i32_0 = arith.constant 0 : i32
    %c0_i32_1 = arith.constant 0 : i32
    return %c0_i32, %c0_i32_0 : i32, i32
  }
  func.func @transform_5(%arg0: i32) -> (i32, i32) {
    %c0_i32 = arith.constant 0 : i32
    %c0_i32_0 = arith.constant 0 : i32
    %c0_i32_1 = arith.constant 0 : i32
    return %c0_i32, %c0_i32_0 : i32, i32
  }
  func.func @transform_6(%arg0: i32) -> (i32, i32) {
    %c0_i32 = arith.constant 0 : i32
    %c0_i32_0 = arith.constant 0 : i32
    %c0_i32_1 = arith.constant 0 : i32
    return %c0_i32, %c0_i32_0 : i32, i32
  }
  func.func @transform_7(%arg0: i32) -> (i32, i32) {
    %c0_i32 = arith.constant 0 : i32
    %c0_i32_0 = arith.constant 0 : i32
    return %arg0, %c0_i32 : i32, i32
  }
}

</mosaic_0001>

<bundles_post_ra>
// kernel: tpu_custom_call.1
= control target key start
LH: loop header
LB: loop body
LE: loop exit
PB: predicated region body
PF: predicated region fallthrough
CT: control target
= control target key end

     0   :  { %12 = vsyncpa [#allocation3], 0  ;;  %s1457_s0 = inlined_call_operand.hbm [shape: f32[8,784], index: 0, kind: input, shape index: {}]   ;;  %s1458_s1 = inlined_call_operand.hbm [shape: bf16[784,128], index: 1, kind: input, shape index: {}]   ;;  %s1459_s2 = inlined_call_operand.vmem [shape: f32[1,128], index: 2, kind: input, shape index: {}]   ;;  %s1460_s3 = inlined_call_operand.hbm [shape: bf16[128,128], index: 3, kind: input, shape index: {}]   ;;  %s1461_s4 = inlined_call_operand.vmem [shape: f32[1,128], index: 4, kind: input, shape index: {}]   ;;  %s1462_s5 = inlined_call_operand.hbm [shape: bf16[128,128], index: 5, kind: input, shape index: {}]   ;;  %s1463_s6 = inlined_call_operand.vmem [shape: f32[1,128], index: 6, kind: input, shape index: {}]   ;;  %s1464_s7 = inlined_call_operand.hbm [shape: f32[8,128], index: 7, kind: output, shape index: {}]  }
   0x1   :  { %13 = vsyncpa [#allocation6], 0 }
   0x2   :  { %14 = vsyncpa [#allocation9], 0 }
   0x3   :  { %15 = vsyncpa [#allocation4], 0  ;;  %s1307_s24 = smov [#allocation5]   ;;  %s1189_s28 = scalar_lea.hbm %s1458_s1, 6272 }
   0x4   :  { %s31_s25 = sshll.u32 %s1307_s24, 4  ;;  %p1190_p0 = scmp.ne.s32.totalorder %s1458_s1, %s1189_s28  ;;  %s32_s25 = int_to_ptr.vmem [resolvable:$true] %s31_s25 }
   0x5   :  { %p1193_p1 = scmp.lt.u32.totalorder %s1189_s28, %s1458_s1 }
   0x7   :  { %p1195_p2 = pnand %p1193_p1, %p1190_p0 }
   0x9   :  { %1198 = shalt.err (!%p1195_p2)
}
   0xa   :  { %s1199_s10 = scalar_lea.vmem %s32_s25, 6272  ;;  %p1204_p4 = scmp.lt.s32.totalorder %s32_s25, %s32_s25 }
   0xb   :  { %p1200_p3 = scmp.ne.s32.totalorder %s32_s25, %s1199_s10  ;;  %p1205_p5 = scmp.lt.s32.totalorder %s1199_s10, %s1199_s10 }
   0xd   :  { %p1206_p6 = por %p1205_p5, %p1204_p4 }
   0xf   :  { %p1207_p7 = pnand %p1206_p6, %p1200_p3 }
  0x11   :  { %1210 = shalt.err (!%p1207_p7)
}
  0x12   :  { %s1308_s11 = smov 64   ;;  %s1309_s12 = smov 4  }
  0x13   :  { %37 = dma.hbm_to_vmem [thread:$0]  %s1458_s1, 6272, %s32_s25, [#allocation6], %s1308_s11, %s1308_s11, %s1309_s12  }
  0x14   :  { %s1310_s15 = smov [#allocation2]   ;;  %s1311_s17 = smov [#allocation7]  }
  0x15   :  { %s22_s16 = sshll.u32 %s1310_s15, 4  ;;  %s45_s18 = sshll.u32 %s1311_s17, 4  ;;  %s23_s16 = int_to_ptr.vmem [resolvable:$true] %s22_s16  ;;  %s46_s18 = int_to_ptr.vmem [resolvable:$true] %s45_s18 }
  0x16   :  { %s1211_s21 = scalar_lea.hbm %s1457_s0, 896 }
  0x17   :  { %p1212_p8 = scmp.ne.s32.totalorder %s1457_s0, %s1211_s21  ;;  %p1215_p9 = scmp.lt.u32.totalorder %s1211_s21, %s1457_s0 }
  0x19   :  { %p1217_p10 = pnand %p1215_p9, %p1212_p8 }
  0x1b   :  { %1220 = shalt.err (!%p1217_p10)
}
  0x1c   :  { %s1221_s1 = scalar_lea.vmem %s23_s16, 896  ;;  %p1226_p12 = scmp.lt.s32.totalorder %s23_s16, %s23_s16 }
  0x1d   :  { %p1222_p11 = scmp.ne.s32.totalorder %s23_s16, %s1221_s1  ;;  %p1227_p13 = scmp.lt.s32.totalorder %s1221_s1, %s1221_s1 }
  0x1f   :  { %p1228_p0 = por %p1227_p13, %p1226_p12 }
  0x21   :  { %p1229_p1 = pnand %p1228_p0, %p1222_p11 }
  0x23   :  { %1232 = shalt.err (!%p1229_p1)
}
  0x24   :  { %25 = dma.hbm_to_vmem [thread:$0]  %s1457_s0, 896, %s23_s16, [#allocation3]  }
  0x25   :  { %s1233_s30 = scalar_lea.hbm %s1460_s3, 1024 }
  0x26   :  { %p1234_p2 = scmp.ne.s32.totalorder %s1460_s3, %s1233_s30  ;;  %p1237_p3 = scmp.lt.u32.totalorder %s1233_s30, %s1460_s3 }
  0x28   :  { %p1239_p4 = pnand %p1237_p3, %p1234_p2 }
  0x2a   :  { %1242 = shalt.err (!%p1239_p4)
}
  0x2b   :  { %s1243_s14 = scalar_lea.vmem %s46_s18, 1024  ;;  %p1248_p6 = scmp.lt.s32.totalorder %s46_s18, %s46_s18 }
  0x2c   :  { %p1244_p5 = scmp.ne.s32.totalorder %s46_s18, %s1243_s14  ;;  %p1249_p7 = scmp.lt.s32.totalorder %s1243_s14, %s1243_s14 }
  0x2e   :  { %p1250_p8 = por %p1249_p7, %p1248_p6 }
  0x30   :  { %p1251_p9 = pnand %p1250_p8, %p1244_p5 }
  0x32   :  { %1254 = shalt.err (!%p1251_p9)
}
  0x33   :  { %51 = dma.hbm_to_vmem [thread:$0]  %s1460_s3, 1024, %s46_s18, [#allocation6], %s1308_s11, %s1308_s11, %s1309_s12  }
  0x34   :  { %s1312_s16 = smov [#allocation8]   ;;  %s1255_s21 = scalar_lea.hbm %s1462_s5, 1024 }
  0x35   :  { %s59_s17 = sshll.u32 %s1312_s16, 4  ;;  %p1256_p10 = scmp.ne.s32.totalorder %s1462_s5, %s1255_s21  ;;  %s60_s17 = int_to_ptr.vmem [resolvable:$true] %s59_s17 }
  0x36   :  { %p1259_p11 = scmp.lt.u32.totalorder %s1255_s21, %s1462_s5 }
  0x38   :  { %p1261_p12 = pnand %p1259_p11, %p1256_p10 }
  0x3a   :  { %1264 = shalt.err (!%p1261_p12)
}
  0x3b   :  { %s1265_s1 = scalar_lea.vmem %s60_s17, 1024  ;;  %p1270_p0 = scmp.lt.s32.totalorder %s60_s17, %s60_s17 }
  0x3c   :  { %p1266_p13 = scmp.ne.s32.totalorder %s60_s17, %s1265_s1  ;;  %p1271_p1 = scmp.lt.s32.totalorder %s1265_s1, %s1265_s1 }
  0x3e   :  { %p1272_p2 = por %p1271_p1, %p1270_p0 }
  0x40   :  { %p1273_p3 = pnand %p1272_p2, %p1266_p13 }
  0x42   :  { %1276 = shalt.err (!%p1273_p3)
}
  0x43   :  { %65 = dma.hbm_to_vmem [thread:$0]  %s1462_s5, 1024, %s60_s17, [#allocation9], %s1308_s11, %s1308_s11, %s1309_s12  }
  0x44   :  { %1299 = dma.done.wait [#allocation3], 896  }
  0x45   :  { %1300 = vsyncadd [#allocation3], 4294966400 }
  0x46   :  { %1301 = dma.done.wait [#allocation6], 7296  }
  0x47   :  { %1302 = vsyncadd [#allocation6], 4294960000 }
  0x48   :  { %1303 = dma.done.wait [#allocation9], 1024  }
  0x49   :  { %1304 = vsyncadd [#allocation9], 4294966272  ;;  %v1120_v0 = vld [vmem:[#allocation5 + $0x40] sm:$0xff]   ;;  %v1124_v4 = vld [vmem:[#allocation5 + $0x48] sm:$0xff]   ;;  %v1313_v44 = vmov 0.0   ;;  %vm1314_vm0 = vmmov 0  }
  0x4a   :  { %v1121_v1 = vld [vmem:[#allocation5] sm:$0xff]   ;;  %979 = vmatprep.subr.bf16.mxu0 %v1120_v0  ;;  %v1125_v5 = vld [vmem:[#allocation5 + $0x8] sm:$0xff]   ;;  %v1128_v8 = vld [vmem:[#allocation5 + $0x50] sm:$0xff]   ;;  %vm494_vm1 = vcmask 130048   ;;  %s1315_s28 = smov [#allocation10]  }
  0x4b   :  { %v1122_v2 = vld [vmem:[#allocation5 + $0xc0] sm:$0xff]   ;;  %980 = vmatpush3.bf16.msra.mxu0 %v1121_v1  ;;  %v1126_v6 = vld [vmem:[#allocation5 + $0xc8] sm:$0xff]   ;;  %v1129_v9 = vld [vmem:[#allocation5 + $0x10] sm:$0xff]   ;;  %s899_s29 = sshll.u32 %s1315_s28, 4  ;;  %s900_s29 = int_to_ptr.vmem [resolvable:$true] %s899_s29 }
  0x4c   :  { %v1123_v3 = vld [vmem:[#allocation5 + $0x80] sm:$0xff]   ;;  %1001 = vmatprep.subr.bf16.mxu1 %v1122_v2  ;;  %981 = vmatprep.subr.bf16.mxu0 %v1124_v4  ;;  %v1127_v7 = vld [vmem:[#allocation5 + $0x88] sm:$0xff]   ;;  %v1130_v10 = vld [vmem:[#allocation5 + $0xd0] sm:$0xff]   ;;  %p1282_p5 = scmp.lt.s32.totalorder %s900_s29, %s900_s29 }
  0x4d   :  { %1002 = vmatpush3.bf16.msra.mxu1 %v1123_v3  ;;  %v1131_v11 = vld [vmem:[#allocation5 + $0x90] sm:$0xff]   ;;  %v1132_v12 = vld [vmem:[#allocation5 + $0x58] sm:$0xff]   ;;  %v1136_v16 = vld [vmem:[#allocation5 + $0x60] sm:$0xff]  }
  0x4e   :  { %1003 = vmatprep.subr.bf16.mxu1 %v1126_v6  ;;  %v1133_v13 = vld [vmem:[#allocation5 + $0x18] sm:$0xff]   ;;  %v1137_v17 = vld [vmem:[#allocation5 + $0x20] sm:$0xff]   ;;  %v1140_v20 = vld [vmem:[#allocation5 + $0x68] sm:$0xff]  }
  0x4f   :  { %982 = vmatpush3.bf16.msra.mxu0 %v1125_v5  ;;  %v1134_v14 = vld [vmem:[#allocation5 + $0xd8] sm:$0xff]   ;;  %v1138_v18 = vld [vmem:[#allocation5 + $0xe0] sm:$0xff]   ;;  %v1141_v21 = vld [vmem:[#allocation5 + $0x28] sm:$0xff]  }
  0x50   :  { %983 = vmatprep.subr.bf16.mxu0 %v1128_v8  ;;  %v1135_v15 = vld [vmem:[#allocation5 + $0x98] sm:$0xff]   ;;  %v1139_v19 = vld [vmem:[#allocation5 + $0xa0] sm:$0xff]   ;;  %v1142_v22 = vld [vmem:[#allocation5 + $0xe8] sm:$0xff]  }
  0x51   :  { %1004 = vmatpush3.bf16.msra.mxu1 %v1127_v7  ;;  %v1143_v23 = vld [vmem:[#allocation5 + $0xa8] sm:$0xff]   ;;  %v1144_v24 = vld [vmem:[#allocation5 + $0x70] sm:$0xff]   ;;  %v1148_v28 = vld [vmem:[#allocation5 + $0x78] sm:$0xff]  }
  0x52   :  { %1005 = vmatprep.subr.bf16.mxu1 %v1130_v10  ;;  %v1145_v25 = vld [vmem:[#allocation5 + $0x30] sm:$0xff]   ;;  %v1149_v29 = vld [vmem:[#allocation5 + $0x38] sm:$0xff]   ;;  %v81_v34 = vld [vmem:[#allocation2] sm:$0xff] }
  0x53   :  { %984 = vmatpush3.bf16.msra.mxu0 %v1129_v9  ;;  %v1146_v26 = vld [vmem:[#allocation5 + $0xf0] sm:$0xff]   ;;  %v1150_v30 = vld [vmem:[#allocation5 + $0xf8] sm:$0xff]   ;;  %v88_v35 = vpack.c.bf16 %v81_v34, %v81_v34  ;;  %v1152_v36 = vld [vmem:[#allocation5 + $0x140] sm:$0xff]  }
  0x54   :  { %985 = vmatprep.subr.bf16.mxu0 %v1132_v12  ;;  %v1147_v27 = vld [vmem:[#allocation5 + $0xb0] sm:$0xff]   ;;  %v1151_v33 = vld [vmem:[#allocation5 + $0xb8] sm:$0xff]   ;;  %v84_v37 = vld [vmem:[#allocation2 + $0x18] sm:$0xff] }
  0x55   :  { %1006 = vmatpush3.bf16.msra.mxu1 %v1131_v11  ;;  %v82_v31 = vld [vmem:[#allocation2 + $0x8] sm:$0xff]  ;;  %v91_v38 = vpack.c.bf16 %v84_v37, %v84_v37  ;;  %v1153_v39 = vld [vmem:[#allocation5 + $0x100] sm:$0xff]   ;;  %v83_v40 = vld [vmem:[#allocation2 + $0x10] sm:$0xff] }
  0x56   :  { %1007 = vmatprep.subr.bf16.mxu1 %v1134_v14  ;;  %v89_v32 = vpack.c.bf16 %v82_v31, %v82_v31  ;;  %v90_v41 = vpack.c.bf16 %v83_v40, %v83_v40  ;;  %v1154_v42 = vld [vmem:[#allocation5 + $0x148] sm:$0xff]   ;;  %v1156_v45 = vld [vmem:[#allocation5 + $0x150] sm:$0xff]   ;;  %v1158_v47 = vld [vmem:[#allocation5 + $0x158] sm:$0xff]  }
  0x57   :  { %986 = vmatpush3.bf16.msra.mxu0 %v1133_v13  ;;  %570 = vmatprep.mubr.bf16.mxu1 %v91_v38  ;;  %v1155_v43 = vld [vmem:[#allocation5 + $0x108] sm:$0xff]   ;;  %v1157_v46 = vld [vmem:[#allocation5 + $0x110] sm:$0xff]   ;;  %v1159_v48 = vld [vmem:[#allocation5 + $0x118] sm:$0xff]  }
  0x58   :  { %987 = vmatprep.subr.bf16.mxu0 %v1136_v16  ;;  %530 = vmatprep.mubr.bf16.mxu0 %v89_v32  ;;  %v1160_v49 = vld [vmem:[#allocation5 + $0x160] sm:$0xff]   ;;  %v1162_v51 = vld [vmem:[#allocation5 + $0x168] sm:$0xff]   ;;  %v86_v54 = vld [vmem:[#allocation2 + $0x28] sm:$0xff] }
  0x59   :  { %1008 = vmatpush3.bf16.msra.mxu1 %v1135_v15  ;;  %v1161_v50 = vld [vmem:[#allocation5 + $0x120] sm:$0xff]   ;;  %v1163_v52 = vld [vmem:[#allocation5 + $0x128] sm:$0xff]   ;;  %v1164_v55 = vld [vmem:[#allocation5 + $0x170] sm:$0xff]   ;;  %v93_v56 = vpack.c.bf16 %v86_v54, %v86_v54 }
  0x5a   :  { %1009 = vmatprep.subr.bf16.mxu1 %v1138_v18  ;;  %v1168_v53 = vld [vmem:[#allocation5 + $0x180] sm:$0xff]   ;;  %v87_v57 = vld [vmem:[#allocation2 + $0x30] sm:$0xff]  ;;  %v1165_v59 = vld [vmem:[#allocation5 + $0x130] sm:$0xff]  }
  0x5b   :  { %988 = vmatpush3.bf16.msra.mxu0 %v1137_v17  ;;  %v94_v58 = vpack.c.bf16 %v87_v57, %v87_v57  ;;  %v1166_v60 = vld [vmem:[#allocation5 + $0x178] sm:$0xff]   ;;  %v85_v62 = vld [vmem:[#allocation2 + $0x20] sm:$0xff]  ;;  %v1170_v1 = vld [vmem:[#allocation7 + $0x8] sm:$0xff]  }
  0x5c   :  { %989 = vmatprep.subr.bf16.mxu0 %v1140_v20  ;;  %v1167_v61 = vld [vmem:[#allocation5 + $0x138] sm:$0xff]   ;;  %v92_v63 = vpack.c.bf16 %v85_v62, %v85_v62  ;;  %v1169_v0 = vld [vmem:[#allocation7] sm:$0xff]   ;;  %v1172_v3 = vld [vmem:[#allocation7 + $0x18] sm:$0xff]  }
  0x5d   :  { %1010 = vmatpush3.bf16.msra.mxu1 %v1139_v19  ;;  %v1171_v2 = vld [vmem:[#allocation7 + $0x10] sm:$0xff]   ;;  %v1173_v4 = vld [vmem:[#allocation7 + $0x20] sm:$0xff]   ;;  %v1174_v5 = vld [vmem:[#allocation7 + $0x28] sm:$0xff]  }
  0x5e   :  { %1011 = vmatprep.subr.bf16.mxu1 %v1142_v22  ;;  %v1175_v6 = vld [vmem:[#allocation7 + $0x30] sm:$0xff]   ;;  %v1176_v7 = vld [vmem:[#allocation7 + $0x38] sm:$0xff]   ;;  %v1177_v8 = vld [vmem:[#allocation8] sm:$0xff]  }
  0x5f   :  { %990 = vmatpush3.bf16.msra.mxu0 %v1141_v21  ;;  %v1178_v9 = vld [vmem:[#allocation8 + $0x8] sm:$0xff]   ;;  %v1179_v10 = vld [vmem:[#allocation8 + $0x10] sm:$0xff]   ;;  %v910_v12 = vld [vmem:[%s1459_s2] ss:$0 sm:$0xff] }
  0x60   :  { %991 = vmatprep.subr.bf16.mxu0 %v1144_v24 }
  0x61   :  { %1012 = vmatpush3.bf16.msra.mxu1 %v1143_v23 }
  0x62   :  { %1013 = vmatprep.subr.bf16.mxu1 %v1146_v26 }
  0x63   :  { %992 = vmatpush3.bf16.msra.mxu0 %v1145_v25 }
  0x64   :  { %993 = vmatprep.subr.bf16.mxu0 %v1148_v28 }
  0x65   :  { %1014 = vmatpush3.bf16.msra.mxu1 %v1147_v27 }
  0x66   :  { %1015 = vmatprep.subr.bf16.mxu1 %v1150_v30 }
  0x67   :  { %994 = vmatpush3.bf16.msra.mxu0 %v1149_v29 }
  0x68   :  { %1023 = vmatprep.subr.bf16.mxu0 %v1152_v36 }
  0x69   :  { %1016 = vmatpush3.bf16.msra.mxu1 %v1151_v33 }
  0x6a   :  { %531 = vmatmul.mubr.bf16.vlgmr.msra.gmra.mrb[0].mxu0 %v88_v35  ;;  %1065 = vmatprep.subr.bf16.mxu1 %v1313_v44 }
  0x6b   :  { %1024 = vmatpush3.bf16.msra.mxu0 %v1153_v39  ;;  %610 = vmatprep.mubr.bf16.mxu0 %v93_v56 }
  0x6c   :  { %571 = vmatmul.mubr.bf16.vlgmr.msra.gmra.mrb[0].mxu1 %v90_v41  ;;  %1025 = vmatprep.subr.bf16.mxu0 %v1154_v42  ;;  %v1180_v41 = vld [vmem:[#allocation8 + $0x18] sm:$0xff]   ;;  %v1181_v42 = vld [vmem:[#allocation8 + $0x20] sm:$0xff]  }
  0x6d   :  { %1067 = vmatprep.mubr.msk.bf16.mxu1 %vm1314_vm0, %v1313_v44  ;;  %1066 = vmatpush3.bf16.msra.mxu1 %v1168_v53 }
  0x6e   :  { %1071 = vmatprep.subr.bf16.mxu1 %v1313_v44 }
  0x6f   :  { %1026 = vmatpush3.bf16.msra.mxu0 %v1155_v43  ;;  %v1182_v43 = vld [vmem:[#allocation8 + $0x28] sm:$0xff]  }
  0x70   :  { %1027 = vmatprep.subr.bf16.mxu0 %v1156_v45  ;;  %v1183_v45 = vld [vmem:[#allocation8 + $0x30] sm:$0xff]  }
  0x73   :  { %1028 = vmatpush3.bf16.msra.mxu0 %v1157_v46  ;;  %v1184_v46 = vld [vmem:[#allocation8 + $0x38] sm:$0xff]  }
  0x74   :  { %1029 = vmatprep.subr.bf16.mxu0 %v1158_v47  ;;  %1068 = vmatmul.mubr.msk.bf16.vlgmr.msra.gmra.mrb[4].mxu1 %vm494_vm1, %v94_v58  ;;  %v961_v47 = vld [vmem:[%s1461_s4] ss:$0 sm:$0xff]  ;;  %s1277_s4 = scalar_lea.vmem %s900_s29, 128 }
  0x75   :  { %1087 = vmatprep.mubr.msk.bf16.mxu1 %vm1314_vm0, %v1313_v44  ;;  %1072 = vmatpush3.bf16.msra.mxu1 %v1169_v0  ;;  %p1278_p4 = scmp.ne.s32.totalorder %s900_s29, %s1277_s4  ;;  %p1283_p6 = scmp.lt.s32.totalorder %s1277_s4, %s1277_s4 }
  0x76   :  { %1073 = vmatprep.subr.bf16.mxu1 %v1313_v44 }
  0x77   :  { %1030 = vmatpush3.bf16.msra.mxu0 %v1159_v48  ;;  %p1284_p7 = por %p1283_p6, %p1282_p5 }
  0x78   :  { %1031 = vmatprep.subr.bf16.mxu0 %v1160_v49 }
  0x79   :  { %1074 = vmatpush3.bf16.msra.mxu1 %v1170_v1  ;;  %p1285_p8 = pnand %p1284_p7, %p1278_p4 }
  0x7a   :  { %1075 = vmatprep.subr.bf16.mxu1 %v1313_v44 }
  0x7b   :  { %1032 = vmatpush3.bf16.msra.mxu0 %v1161_v50 }
  0x7c   :  { %1033 = vmatprep.subr.bf16.mxu0 %v1162_v51 }
  0x7d   :  { %1076 = vmatpush3.bf16.msra.mxu1 %v1171_v2 }
  0x7e   :  { %1077 = vmatprep.subr.bf16.mxu1 %v1313_v44 }
  0x7f   :  { %1034 = vmatpush3.bf16.msra.mxu0 %v1163_v52 }
  0x80   :  { %1035 = vmatprep.subr.bf16.mxu0 %v1164_v55 }
  0x81   :  { %1078 = vmatpush3.bf16.msra.mxu1 %v1172_v3 }
  0x82   :  { %1079 = vmatprep.subr.bf16.mxu1 %v1313_v44 }
  0x83   :  { %1036 = vmatpush3.bf16.msra.mxu0 %v1165_v59 }
  0x84   :  { %1037 = vmatprep.subr.bf16.mxu0 %v1166_v60 }
  0x85   :  { %1080 = vmatpush3.bf16.msra.mxu1 %v1173_v4 }
  0x86   :  { %1081 = vmatprep.subr.bf16.mxu1 %v1313_v44 }
  0x87   :  { %1038 = vmatpush3.bf16.msra.mxu0 %v1167_v61 }
  0x88   :  { %1091 = vmatprep.subr.bf16.mxu0 %v1313_v44 }
  0x89   :  { %1082 = vmatpush3.bf16.msra.mxu1 %v1174_v5 }
  0x8a   :  { %611 = vmatmul.mubr.bf16.vlgmr.msra.gmra.mrb[4].mxu0 %v92_v63  ;;  %1083 = vmatprep.subr.bf16.mxu1 %v1313_v44 }
  0x8b   :  { %1107 = vmatprep.mubr.msk.bf16.mxu0 %vm1314_vm0, %v1313_v44  ;;  %1092 = vmatpush3.bf16.msra.mxu0 %v1177_v8 }
  0x8c   :  { %1093 = vmatprep.subr.bf16.mxu0 %v1313_v44 }
  0x8d   :  { %1084 = vmatpush3.bf16.msra.mxu1 %v1175_v6 }
  0x8e   :  { %1085 = vmatprep.subr.bf16.mxu1 %v1313_v44 }
  0x8f   :  { %1094 = vmatpush3.bf16.msra.mxu0 %v1178_v9 }
  0x90   :  { %1095 = vmatprep.subr.bf16.mxu0 %v1313_v44 }
  0x91   :  { %1086 = vmatpush3.bf16.msra.mxu1 %v1176_v7 }
  0x93   :  { %1096 = vmatpush3.bf16.msra.mxu0 %v1179_v10 }
  0x94   :  { %1097 = vmatprep.subr.bf16.mxu0 %v1313_v44 }
  0x97   :  { %1098 = vmatpush3.bf16.msra.mxu0 %v1180_v41 }
  0x98   :  { %1099 = vmatprep.subr.bf16.mxu0 %v1313_v44 }
  0x9b   :  { %1100 = vmatpush3.bf16.msra.mxu0 %v1181_v42 }
  0x9c   :  { %1101 = vmatprep.subr.bf16.mxu0 %v1313_v44 }
  0x9f   :  { %1102 = vmatpush3.bf16.msra.mxu0 %v1182_v43 }
  0xa0   :  { %1103 = vmatprep.subr.bf16.mxu0 %v1313_v44 }
  0xa3   :  { %1104 = vmatpush3.bf16.msra.mxu0 %v1183_v45 }
  0xa4   :  { %1105 = vmatprep.subr.bf16.mxu0 %v1313_v44  ;;  %v970_v44 = vld [vmem:[%s1463_s6] ss:$0 sm:$0xff] }
  0xa7   :  { %1106 = vmatpush3.bf16.msra.mxu0 %v1184_v46 }
 0x13d   :  { %v995_v11 = vpop.f32.mrb[0].mxu0 }
 0x13e   :  { %v996_v13 = vpop.f32.mrb[1].mxu0 }
 0x13f   :  { %v997_v14 = vadd.f32 %v996_v13, %v995_v11  ;;  %v998_v15 = vpop.f32.mrb[2].mxu0  ;;  %v1017_v16 = vpop.f32.mrb[0].mxu1 }
 0x140   :  { %v999_v17 = vpop.f32.mrb[3].mxu0  ;;  %v1018_v19 = vpop.f32.mrb[1].mxu1 }
 0x141   :  { %v533_v18 = vadd.f32 %v997_v14, %v910_v12  ;;  %v1019_v20 = vadd.f32 %v1018_v19, %v1017_v16  ;;  %v1020_v21 = vpop.f32.mrb[2].mxu1 }
 0x142   :  { %v1021_v22 = vpop.f32.mrb[3].mxu1 }
 0x143   :  { %v573_v23 = vadd.f32 %v1019_v20, %v533_v18 }
 0x147   :  { %v652_v24 = vpop.f32.mrb[4].mxu1 }
 0x148   :  { %v1069_v25 = vpop.f32.mrb[5].mxu1 }
 0x149   :  { %v655_v26 = vpop.f32.mrb[6].mxu1 }
 0x14a   :  { %v1070_v27 = vpop.f32.mrb[7].mxu1 }
 0x15d   :  { %v1039_v28 = vpop.f32.mrb[4].mxu0 }
 0x15e   :  { %v1040_v29 = vpop.f32.mrb[5].mxu0 }
 0x15f   :  { %v1041_v30 = vadd.f32 %v1040_v29, %v1039_v28  ;;  %v1042_v31 = vpop.f32.mrb[6].mxu0 }
 0x160   :  { %v1043_v32 = vpop.f32.mrb[7].mxu0 }
 0x161   :  { %v613_v33 = vadd.f32 %v1041_v30, %v573_v23 }
 0x163   :  { %v653_v34 = vadd.f32 %v652_v24, %v613_v33 }
 0x165   :  { %v659_v35 = vmul.f32 0.70710677, %v653_v34  ;;  %v658_v37 = vmul.f32 0.5, %v653_v34 }
 0x167   :  { %1185 = verf.f32 %v659_v35 }
 0x171   :  { %v1186_v36 = vpop.eup %1185 }
 0x172   :  { %v661_v38 = vadd.f32 1.0, %v1186_v36 }
 0x174   :  { %v662_v39 = vmul.f32 %v661_v38, %v658_v37 }
 0x176   :  { %v663_v40 = vpack.c.bf16 %v662_v39, %v662_v39 }
 0x178   :  { %1088 = vmatmul.mubr.bf16.vlgmr.msra.gmra.mrb[8].mxu1 %v663_v40 }
 0x24b   :  { %v769_v48 = vpop.f32.mrb[8].mxu1 }
 0x24c   :  { %v770_v49 = vadd.f32 %v961_v47, %v769_v48  ;;  %v1089_v50 = vpop.f32.mrb[9].mxu1 }
 0x24d   :  { %v772_v51 = vpop.f32.mrb[10].mxu1 }
 0x24e   :  { %v776_v52 = vmul.f32 0.70710677, %v770_v49  ;;  %v1090_v53 = vpop.f32.mrb[11].mxu1  ;;  %v775_v55 = vmul.f32 0.5, %v770_v49 }
 0x250   :  { %1187 = verf.f32 %v776_v52 }
 0x25a   :  { %v1188_v54 = vpop.eup %1187 }
 0x25b   :  { %v778_v56 = vadd.f32 1.0, %v1188_v54 }
 0x25d   :  { %v779_v57 = vmul.f32 %v778_v56, %v775_v55 }
 0x25f   :  { %v780_v58 = vpack.c.bf16 %v779_v57, %v779_v57 }
 0x261   :  { %1108 = vmatmul.mubr.bf16.vlgmr.msra.gmra.mrb[8].mxu0 %v780_v58 }
 0x334   :  { %v886_v59 = vpop.f32.mrb[8].mxu0 }
 0x335   :  { %v887_v60 = vadd.f32 %v970_v44, %v886_v59  ;;  %v1109_v61 = vpop.f32.mrb[9].mxu0 }
 0x336   :  { %v889_v62 = vpop.f32.mrb[10].mxu0 }
 0x337   :  { %892 = vst [vmem:[#allocation10] sm:$0xff] %v887_v60  ;;  %v1110_v63 = vpop.f32.mrb[11].mxu0 }
 0x338   :  { %1288 = shalt.err (!%p1285_p8)
}
 0x339   :  { %s1289_s6 = scalar_lea.hbm %s1464_s7, 128 }
 0x33a   :  { %p1290_p9 = scmp.ne.s32.totalorder %s1464_s7, %s1289_s6  ;;  %p1293_p10 = scmp.lt.u32.totalorder %s1289_s6, %s1464_s7 }
 0x33c   :  { %p1295_p11 = pnand %p1293_p10, %p1290_p9 }
 0x33e   :  { %1298 = shalt.err (!%p1295_p11)
}
 0x33f   :  { %902 = dma.vmem_to_hbm [thread:$0]  %s900_s29, 128, %s1464_s7, [#allocation4]  }
 0x340   :  { %1305 = dma.done.wait [#allocation4], 128  }
 0x341   :  { %1306 = vsyncadd [#allocation4], 4294967168 }
 0x342   :  { %906 = vsyncpa [#allocation3], 1 }
 0x343   :  { %907 = vsyncpa [#allocation6], 1 }
 0x344   :  { %908 = vsyncpa [#allocation9], 1 }
 0x345   :  { %909 = vsyncpa [#allocation4], 1 }

</bundles_post_ra>
